<compile_context>
chip_gen: v7x
topology: tpu7x:2x2x1
jax: 0.10.0
libtpu: 0.0.40
codegen_flags: <defaults>
</compile_context>

<pallas_src>
import functools

import jax
import jax.numpy as jnp
from jax.experimental import pallas as pl
from jax.experimental.pallas import tpu as pltpu


_LANES = 128
_MAX_COLS = 8192                         # widest lane-dense slab considered
_TARGET_BLOCK_BYTES = 4 * 1024 * 1024    # ~4 MiB per block
_SINGLE_BLOCK_BYTES = 1 * 1024 * 1024    # below this, one grid step is fine
_VMEM_LIMIT_BYTES = 32 * 1024 * 1024     # 2 bufs in + 2 bufs out @ 4 MiB + slack


def _rezero_kernel(y_ref, g_ref, o_ref, *, elementwise_fn=None):
    """o = fn(y) * g   (fn optional & elementwise; g is a scalar in SMEM)."""
    g = g_ref[0]                                  # read the SMEM scalar once
    y = y_ref[...]
    if elementwise_fn is not None:
        y = elementwise_fn(y)
    o_ref[...] = (y * g.astype(y.dtype)).astype(o_ref.dtype)


def _largest_tile_rows(rows, cap):
    """Largest multiple of 8 that divides `rows` and is <= cap (or None)."""
    cap = min(cap, rows)
    cap -= cap % 8
    for t in range(cap, 0, -8):
        if rows % t == 0:
            return t
    return None


def _choose_slab(n, itemsize):
    """Lane-dense (rows, cols, tile_rows) factorization of n with no padding.

    cols is the widest multiple of 128 (<= 8192) dividing n; tile_rows is a
    multiple-of-8 divisor of rows targeting ~4 MiB blocks, with >= 2 grid steps
    for bandwidth-limited sizes (lets both v7x TensorCores drive HBM).
    Returns None if no such factorization exists.
    """
    total_bytes = n * itemsize
    cols = _MAX_COLS
    while cols >= _LANES:
        if n % cols == 0:
            rows = n // cols
            if total_bytes <= _SINGLE_BLOCK_BYTES or rows < 16:
                return rows, cols, rows                  # whole array, one block
            cap = max(8, min(_TARGET_BLOCK_BYTES // (cols * itemsize), rows // 2))
            tr = _largest_tile_rows(rows, cap)
            if tr is not None:
                return rows, cols, tr
        cols //= 2
    return None


def _rezero_scale(y, g, *, elementwise_fn=None):
    """out = elementwise_fn(y) * g  as a Pallas TPU kernel (fn optional)."""
    orig_shape = y.shape
    orig_dtype = y.dtype
    n = y.size
    itemsize = y.dtype.itemsize

    if n == 0:
        out = elementwise_fn(y) if elementwise_fn is not None else y
        return (out * jnp.asarray(g, out.dtype).reshape(())).astype(orig_dtype)

    slab = _choose_slab(n, itemsize)
    if slab is None:
        if n * itemsize <= _TARGET_BLOCK_BYTES:
            # Ragged but small: one full-array block (block == full dims is
            # exempt from the (8,128) constraint; no padding / slicing needed).
            rows, cols, tile_rows = 1, n, 1
        else:
            # TODO(synk): huge tensors whose element count has no usable
            # multiple-of-128 factorization fall back to plain (XLA-fused) JAX
            # to avoid the full-tensor pad/slice HBM copies flagged in review.
            out = elementwise_fn(y) if elementwise_fn is not None else y
            g_s = jnp.asarray(g, jnp.float32).reshape(())
            return (out * g_s.astype(out.dtype)).astype(orig_dtype)
    else:
        rows, cols, tile_rows = slab

    y2 = y.reshape(rows, cols)                    # free view, no HBM copy
    g_arr = jnp.asarray(g, dtype=jnp.float32).reshape(1)
    grid = rows // tile_rows

    kernel = functools.partial(_rezero_kernel, elementwise_fn=elementwise_fn)

    out2 = pl.pallas_call(
        kernel,
        out_shape=jax.ShapeDtypeStruct((rows, cols), orig_dtype),
        grid_spec=pltpu.PrefetchScalarGridSpec(
            num_scalar_prefetch=0,
            grid=(grid,),
            in_specs=[
                pl.BlockSpec((tile_rows, cols), lambda i: (i, 0)),      # data
                pl.BlockSpec(memory_space=pltpu.MemorySpace.SMEM),      # scalar g
            ],
            out_specs=pl.BlockSpec((tile_rows, cols), lambda i: (i, 0)),
        ),
        compiler_params=pltpu.CompilerParams(
            dimension_semantics=("parallel",),    # shard grid across TCs (v7x)
            vmem_limit_bytes=_VMEM_LIMIT_BYTES,   # big tiles OK even on v5e default
        ),
        cost_estimate=pl.CostEstimate(
            flops=n,
            transcendentals=n if elementwise_fn is not None else 0,
            bytes_accessed=2 * n * itemsize + 4,
        ),
    )(y2, g_arr)

    return out2.reshape(orig_shape)


def rezero_forward(fn, x, g, *, fn_is_elementwise=False):
    """Rezero.forward: fn(x) * g.

    Elementwise fns are fused into the Pallas gate kernel (one HBM round trip).
    Non-elementwise fns are evaluated as plain JAX and the scalar gate is left
    to XLA's epilogue fusion (a separate Pallas gate would add an extra full
    HBM read+write of fn(x) for no benefit).
    """
    if fn is None:
        return _rezero_scale(x, g)
    if fn_is_elementwise:
        return _rezero_scale(x, g, elementwise_fn=fn)
    # TODO(synk): `fn` is an arbitrary wrapped nn.Module (attention/conv/...);
    # it has no generic Pallas translation here, so it runs as ordinary JAX.
    y = fn(x)
    g_s = jnp.asarray(g, jnp.float32).reshape(())
    return (y * g_s.astype(y.dtype)).astype(y.dtype)


if __name__ == "__main__":
    key = jax.random.PRNGKey(0)
    kx, kg, kz = jax.random.split(key, 3)

    # Small module-consistent shape: (batch, channels, height, width).
    x = jax.random.normal(kx, (2, 4, 16, 16), dtype=jnp.float32)
    fn = jnp.tanh  # stand-in for the wrapped sub-module (elementwise -> fused)

    # 1) Freshly-initialised Rezero: g = 0  ->  output must be exactly zero.
    g0 = jnp.zeros((1,), dtype=jnp.float32)
    out0 = jax.block_until_ready(rezero_forward(fn, x, g0, fn_is_elementwise=True))
    assert out0.shape == x.shape and out0.dtype == x.dtype
    assert jnp.all(out0 == 0.0), "Rezero with g=0 must return zeros"

    # 2) Non-trivial gate value (as after training): compare vs JAX reference.
    g1 = jax.random.normal(kg, (1,), dtype=jnp.float32)
    out1 = jax.block_until_ready(rezero_forward(fn, x, g1, fn_is_elementwise=True))
    ref1 = fn(x) * g1[0]
    assert jnp.allclose(out1, ref1, atol=1e-5, rtol=1e-5), "mismatch vs reference"

    # 3) Multi-block path (grid > 1): bandwidth-limited tensor, >= 2 grid steps.
    z = jax.random.normal(kz, (8, 64, 32, 32), dtype=jnp.float32)
    out3 = jax.block_until_ready(rezero_forward(fn, z, g1, fn_is_elementwise=True))
    ref3 = fn(z) * g1[0]
    assert jnp.allclose(out3, ref3, atol=1e-5, rtol=1e-5), "mismatch (tiled path)"

    # 4) Non-elementwise wrapped fn: evaluated in JAX, gate fused by XLA.
    def fn2(t):  # toy channel-mixing fn standing in for attention/conv
        b, c, h, w = t.shape
        mix = jnp.eye(c, dtype=t.dtype) * 2.0
        return jnp.einsum("bchw,cd->bdhw", t, mix)

    out4 = jax.block_until_ready(rezero_forward(fn2, x, g1))
    ref4 = fn2(x) * g1[0]
    assert jnp.allclose(out4, ref4, atol=1e-5, rtol=1e-5), "mismatch (non-elementwise)"

    print("KERNEL_OK")
</pallas_src>

<mosaic_0001>
module attributes {stable_mosaic.version = 11 : i64} {
  func.func @_rezero_kernel(%arg0: i32, %arg1: memref<1x2048xf32, #tpu.memory_space<vmem>>, %arg2: memref<1xf32, #tpu.memory_space<smem>>, %arg3: memref<1x2048xf32, #tpu.memory_space<vmem>>) attributes {dimension_semantics = [#tpu.dimension_semantics<parallel>], iteration_bounds = array<i64: 1>, scalar_prefetch = 0 : i64, scratch_operands = 0 : i64, tpu.core_type = #tpu.core_type<tc>, window_params = [{transform_indices = @transform_0, window_bounds = array<i64: 1, 2048>}, {transform_indices = @transform_1, window_bounds = array<i64: 1>}, {transform_indices = @transform_2, window_bounds = array<i64: 1, 2048>}]} {
    %c0 = arith.constant 0 : index
    %0 = memref.load %arg2[%c0] : memref<1xf32, #tpu.memory_space<smem>>
    %c0_0 = arith.constant 0 : index
    %c0_1 = arith.constant 0 : index
    %1 = vector.load %arg1[%c0_0, %c0_1] : memref<1x2048xf32, #tpu.memory_space<vmem>>, vector<1x2048xf32>
    %2 = math.tanh %1 : vector<1x2048xf32>
    %3 = vector.broadcast %0 : f32 to vector<1x2048xf32>
    %4 = arith.mulf %2, %3 : vector<1x2048xf32>
    %c0_2 = arith.constant 0 : index
    %c0_3 = arith.constant 0 : index
    %5 = vector.load %arg3[%c0_2, %c0_3] : memref<1x2048xf32, #tpu.memory_space<vmem>>, vector<1x2048xf32>
    tpu.vector_store %arg3[%c0_2, %c0_3], %4 {strides = array<i32>} : memref<1x2048xf32, #tpu.memory_space<vmem>>, vector<1x2048xf32>,
    return
  }
  func.func @transform_0(%arg0: i32) -> (i32, i32) {
    %c0_i32 = arith.constant 0 : i32
    %c0_i32_0 = arith.constant 0 : i32
    return %arg0, %c0_i32 : i32, i32
  }
  func.func @transform_1(%arg0: i32) -> i32 {
    %c0_i32 = arith.constant 0 : i32
    %c0_i32_0 = arith.constant 0 : i32
    return %c0_i32 : i32
  }
  func.func @transform_2(%arg0: i32) -> (i32, i32) {
    %c0_i32 = arith.constant 0 : i32
    %c0_i32_0 = arith.constant 0 : i32
    return %arg0, %c0_i32 : i32, i32
  }
}

</mosaic_0001>

<bundles_post_ra>
// kernel: tpu_custom_call.1
= control target key start
LH: loop header
LB: loop body
LE: loop exit
PB: predicated region body
PF: predicated region fallthrough
CT: control target
= control target key end

     0   :  { %8 = vsyncpa [#allocation4], 0  ;;  %s148_s0 = inlined_call_operand.hbm [shape: f32[1,2048], index: 0, kind: input, shape index: {}]   ;;  %s149_s1 = inlined_call_operand.<no memory space> [shape: f32[1], index: 1, kind: input, shape index: {}]   ;;  %s150_s2 = inlined_call_operand.hbm [shape: f32[1,2048], index: 2, kind: output, shape index: {}]  }
   0x1   :  { %9 = vsyncpa [#allocation5], 0  ;;  %s104_s9 = smov [#allocation3]   ;;  %s56_s13 = scalar_lea.hbm %s148_s0, 256 }
   0x2   :  { %s16_s10 = sshll.u32 %s104_s9, 4  ;;  %p57_p0 = scmp.ne.s32.totalorder %s148_s0, %s56_s13  ;;  %s17_s10 = int_to_ptr.vmem [resolvable:$true] %s16_s10 }
   0x3   :  { %p60_p1 = scmp.lt.u32.totalorder %s56_s13, %s148_s0 }
   0x5   :  { %p62_p2 = pnand %p60_p1, %p57_p0 }
   0x7   :  { %65 = shalt.err (!%p62_p2)
}
   0x8   :  { %s66_s18 = scalar_lea.vmem %s17_s10, 256  ;;  %p71_p4 = scmp.lt.s32.totalorder %s17_s10, %s17_s10 }
   0x9   :  { %p67_p3 = scmp.ne.s32.totalorder %s17_s10, %s66_s18  ;;  %p72_p5 = scmp.lt.s32.totalorder %s66_s18, %s66_s18 }
   0xb   :  { %p73_p6 = por %p72_p5, %p71_p4 }
   0xd   :  { %p74_p7 = pnand %p73_p6, %p67_p3 }
   0xf   :  { %77 = shalt.err (!%p74_p7)
}
  0x10   :  { %19 = dma.hbm_to_vmem [thread:$0]  %s148_s0, 256, %s17_s10, [#allocation4]  }
  0x11   :  { %100 = dma.done.wait [#allocation4], 256  }
  0x12   :  { %101 = vsyncadd [#allocation4], 4294967040  ;;  %v26_v0 = vld [vmem:[#allocation3] sm:$0xff]  ;;  %v27_v1 = vld [vmem:[#allocation3 + $0x8] sm:$0xff]  ;;  %v30_v2 = vstv %s149_s1  ;;  %s105_s23 = smov [#allocation6]  }
  0x13   :  { %52 = vtanh.f32 %v26_v0  ;;  %s41_s24 = sshll.u32 %s105_s23, 4  ;;  %s42_s24 = int_to_ptr.vmem [resolvable:$true] %s41_s24 }
  0x14   :  { %54 = vtanh.f32 %v27_v1  ;;  %s78_s0 = scalar_lea.vmem %s42_s24, 256  ;;  %p83_p9 = scmp.lt.s32.totalorder %s42_s24, %s42_s24 }
  0x15   :  { %p79_p8 = scmp.ne.s32.totalorder %s42_s24, %s78_s0  ;;  %p84_p10 = scmp.lt.s32.totalorder %s78_s0, %s78_s0 }
  0x17   :  { %p85_p11 = por %p84_p10, %p83_p9 }
  0x19   :  { %p86_p12 = pnand %p85_p11, %p79_p8 }
  0x1d   :  { %v53_v3 = vpop.eup %52 }
  0x1e   :  { %v55_v4 = vpop.eup %54  ;;  %v31_v5 = vmul.f32 %v53_v3, %v30_v2 }
  0x1f   :  { %v32_v6 = vmul.f32 %v55_v4, %v30_v2 }
  0x20   :  { %33 = vst [vmem:[#allocation6] sm:$0xff] %v31_v5 }
  0x21   :  { %34 = vst [vmem:[#allocation6 + $0x8] sm:$0xff] %v32_v6 }
  0x22   :  { %89 = shalt.err (!%p86_p12)
}
  0x23   :  { %s90_s1 = scalar_lea.hbm %s150_s2, 256 }
  0x24   :  { %p91_p13 = scmp.ne.s32.totalorder %s150_s2, %s90_s1  ;;  %p94_p0 = scmp.lt.u32.totalorder %s90_s1, %s150_s2 }
  0x26   :  { %p96_p1 = pnand %p94_p0, %p91_p13 }
  0x28   :  { %99 = shalt.err (!%p96_p1)
}
  0x29   :  { %44 = dma.vmem_to_hbm [thread:$0]  %s42_s24, 256, %s150_s2, [#allocation5]  }
  0x2a   :  { %102 = dma.done.wait [#allocation5], 256  }
  0x2b   :  { %103 = vsyncadd [#allocation5], 4294967040 }
  0x2c   :  { %48 = vsyncpa [#allocation4], 1 }
  0x2d   :  { %49 = vsyncpa [#allocation5], 1 }

</bundles_post_ra>
